<compile_context>
chip_gen: v7x
topology: tpu7x:2x2x1
jax: 0.10.0
libtpu: 0.0.40
codegen_flags: <defaults>
</compile_context>

<pallas_src>
import functools

import jax
import jax.numpy as jnp
from jax.experimental import pallas as pl
from jax.experimental.pallas import tpu as pltpu


VOCAB = 20  # nn.Embedding(20, ...), padding_idx=0


# ----------------------------- Pallas kernel -----------------------------

def _gru_encoder_kernel(tok_ref, gi_tab_ref, wh_ref, bhn_ref, o_ref, *, T, Bp):
    """Fused embedding lookup-table matmul + full GRU recurrence.

    tok_ref    : (T*Bp, 1) int32   time-major flattened token ids (row = t*Bp + b)
    gi_tab_ref : (Vp, 3H)  f32     emb_p @ [W_ir^T|W_iz^T|W_in^T] + [b_r|b_z|b_in]
    wh_ref     : (H, 3H)   f32     [W_hr^T | W_hz^T | W_hn^T]
    bhn_ref    : (1, H)    f32     b_hn (applied inside r * (W_hn h + b_hn))
    o_ref      : (B, H)    f32     final hidden state == PyTorch output[:, -1]
    """
    B, H = o_ref.shape
    Vp = gi_tab_ref.shape[0]
    TB = T * Bp

    # --- prologue: one matmul does embedding lookup + all input projections ---
    tok = tok_ref[...]                                              # (T*Bp, 1) i32
    vocab_iota = jax.lax.broadcasted_iota(jnp.int32, (TB, Vp), 1)   # (T*Bp, Vp)
    one_hot = (vocab_iota == tok).astype(jnp.float32)               # (T*Bp, Vp)
    gi_all = jnp.dot(one_hot, gi_tab_ref[...],
                     preferred_element_type=jnp.float32)            # (T*Bp, 3H)

    # Lane-split the precomputed gate inputs once (outside the serial loop).
    gi_r_all = gi_all[:, 0:H]
    gi_z_all = gi_all[:, H:2 * H]
    gi_n_all = gi_all[:, 2 * H:3 * H]

    wh = wh_ref[...]                                                # (H, 3H)
    bhn = jnp.broadcast_to(bhn_ref[...], (Bp, H))                   # hoisted broadcast

    # --- serial recurrence: h register-carried, loop fully unrolled ---
    h = jnp.zeros((Bp, H), jnp.float32)
    for t in range(T):
        lo = t * Bp                                                 # 8-sublane aligned
        gh = jnp.dot(h, wh, preferred_element_type=jnp.float32)     # (Bp, 3H), 1 MXU op
        r = jax.nn.sigmoid(gi_r_all[lo:lo + Bp, :] + gh[:, 0:H])
        z = jax.nn.sigmoid(gi_z_all[lo:lo + Bp, :] + gh[:, H:2 * H])
        n = jnp.tanh(gi_n_all[lo:lo + Bp, :] + r * (gh[:, 2 * H:3 * H] + bhn))
        h = n + z * (h - n)

    o_ref[...] = h[:B, :]   # padded rows are never stored


# ----------------------------- One-time parameter prep -----------------------------

def prepare_gru_encoder(params):
    """Fold/transpose parameters once (runs once; not per forward call)."""
    emb = params["emb"].astype(jnp.float32)
    V, E = emb.shape
    H = params["w_hh"].shape[1]

    # Pad vocab rows to a sublane multiple; extra rows are never selected.
    Vp = ((V + 7) // 8) * 8
    emb_p = jnp.pad(emb, ((0, Vp - V), (0, 0)))

    w_ih, w_hh = params["w_ih"], params["w_hh"]
    b_ih, b_hh = params["b_ih"], params["b_hh"]

    # Per-gate transposed weights: [r | z | n] row blocks of the PyTorch layout.
    wir, wiz, win = [jnp.transpose(w_ih[g * H:(g + 1) * H]) for g in range(3)]
    whr, whz, whn = [jnp.transpose(w_hh[g * H:(g + 1) * H]) for g in range(3)]

    # Folded biases: r/z only ever see (b_i + b_h); the n gate needs them split.
    br = b_ih[0:H] + b_hh[0:H]
    bz = b_ih[H:2 * H] + b_hh[H:2 * H]
    bin_ = b_ih[2 * H:3 * H]
    bhn = b_hh[2 * H:3 * H].reshape(1, H)

    wi_cat = jnp.concatenate([wir, wiz, win], axis=1)               # (E, 3H)
    bias_cat = jnp.concatenate([br, bz, bin_]).reshape(1, 3 * H)    # (1, 3H)
    gi_table = emb_p @ wi_cat + bias_cat                            # (Vp, 3H)
    wh_cat = jnp.concatenate([whr, whz, whn], axis=1)               # (H, 3H)

    return dict(
        gi_table=gi_table.astype(jnp.float32),
        wh_cat=wh_cat.astype(jnp.float32),
        b_hn=bhn.astype(jnp.float32),
    )


# ----------------------------- Forward wrapper -----------------------------

def gru_encoder_forward(prepared, mission):
    """Equivalent of GruEncoder.forward: embedding -> GRU -> output[:, -1]."""
    B, T = mission.shape
    assert T >= 1, "GRU recurrence needs at least one timestep"
    gi_table = prepared["gi_table"]
    wh_cat = prepared["wh_cat"]
    b_hn = prepared["b_hn"]
    H = wh_cat.shape[0]

    # Pad batch to the 8-sublane tile with token id 0 (zero embedding row).
    Bp = ((B + 7) // 8) * 8
    mission_p = jnp.pad(mission.astype(jnp.int32), ((0, Bp - B), (0, 0)))
    # Time-major flattened token ids: row t*Bp + b holds mission[b, t].
    tok2d = jnp.transpose(mission_p).reshape(T * Bp, 1)

    return pl.pallas_call(
        functools.partial(_gru_encoder_kernel, T=T, Bp=Bp),
        out_shape=jax.ShapeDtypeStruct((B, H), jnp.float32),
        in_specs=[
            pl.BlockSpec(memory_space=pltpu.MemorySpace.VMEM),   # token ids
            pl.BlockSpec(memory_space=pltpu.MemorySpace.VMEM),   # gi_table (Vp, 3H)
            pl.BlockSpec(memory_space=pltpu.MemorySpace.VMEM),   # Wh_cat   (H, 3H)
            pl.BlockSpec(memory_space=pltpu.MemorySpace.VMEM),   # b_hn     (1, H)
        ],
        out_specs=pl.BlockSpec(memory_space=pltpu.MemorySpace.VMEM),
    )(tok2d, gi_table, wh_cat, b_hn)


# ----------------------------- Parameter init -----------------------------

def init_params(key, embedding_dim, hidden_size):
    """Deterministic parameter init mimicking the PyTorch module's shapes."""
    k_emb, k_wih, k_whh, k_bih, k_bhh = jax.random.split(key, 5)
    bound = 1.0 / jnp.sqrt(jnp.float32(hidden_size))

    emb = jax.random.normal(k_emb, (VOCAB, embedding_dim), jnp.float32)
    emb = emb.at[0].set(0.0)  # padding_idx=0

    w_ih = jax.random.uniform(k_wih, (3 * hidden_size, embedding_dim), jnp.float32, -bound, bound)
    w_hh = jax.random.uniform(k_whh, (3 * hidden_size, hidden_size), jnp.float32, -bound, bound)
    b_ih = jax.random.uniform(k_bih, (3 * hidden_size,), jnp.float32, -bound, bound)
    b_hh = jax.random.uniform(k_bhh, (3 * hidden_size,), jnp.float32, -bound, bound)
    return dict(emb=emb, w_ih=w_ih, w_hh=w_hh, b_ih=b_ih, b_hh=b_hh)


# ----------------------------- Pure-JAX reference -----------------------------

def gru_encoder_reference(params, mission):
    x = jnp.take(params["emb"], mission, axis=0)  # (B, T, E)
    B, T, E = x.shape
    H = params["w_hh"].shape[1]
    wih_t = params["w_ih"].T
    whh_t = params["w_hh"].T
    b_ih = params["b_ih"]
    b_hh = params["b_hh"]

    def step(h, x_t):
        gi = x_t @ wih_t + b_ih
        gh = h @ whh_t + b_hh
        i_r, i_z, i_n = gi[:, :H], gi[:, H:2 * H], gi[:, 2 * H:]
        h_r, h_z, h_n = gh[:, :H], gh[:, H:2 * H], gh[:, 2 * H:]
        r = jax.nn.sigmoid(i_r + h_r)
        z = jax.nn.sigmoid(i_z + h_z)
        n = jnp.tanh(i_n + r * h_n)
        h_new = (1.0 - z) * n + z * h
        return h_new, None

    h0 = jnp.zeros((B, H), jnp.float32)
    h_last, _ = jax.lax.scan(step, h0, jnp.transpose(x, (1, 0, 2)))
    return h_last


# ----------------------------- Main -----------------------------

if __name__ == "__main__":
    B, T = 2, 8
    embedding_dim = 32
    gru_hidden_size = 32

    key = jax.random.PRNGKey(0)
    k_params, k_tok = jax.random.split(key)

    params = init_params(k_params, embedding_dim, gru_hidden_size)
    mission = jax.random.randint(k_tok, (B, T), 0, VOCAB, dtype=jnp.int32)

    prepared = prepare_gru_encoder(params)            # one-time, not per call
    fwd = jax.jit(gru_encoder_forward)

    out = jax.block_until_ready(fwd(prepared, mission))

    ref = gru_encoder_reference(params, mission)
    assert out.shape == (B, gru_hidden_size)
    assert jnp.allclose(out, ref, atol=1e-4, rtol=1e-4), "Pallas GRU mismatch vs reference"

    print("KERNEL_OK")
</pallas_src>

<mosaic_0001>
module attributes {stable_mosaic.version = 11 : i64} {
  func.func @_gru_encoder_kernel(%arg0: memref<64x1xi32, #tpu.memory_space<vmem>>, %arg1: memref<24x96xf32, #tpu.memory_space<vmem>>, %arg2: memref<32x96xf32, #tpu.memory_space<vmem>>, %arg3: memref<1x32xf32, #tpu.memory_space<vmem>>, %arg4: memref<2x32xf32, #tpu.memory_space<vmem>>) attributes {dimension_semantics = [], scalar_prefetch = 0 : i64, scratch_operands = 0 : i64, tpu.core_type = #tpu.core_type<tc>} {
    %c0 = arith.constant 0 : index
    %c0_0 = arith.constant 0 : index
    %0 = vector.load %arg0[%c0, %c0_0] : memref<64x1xi32, #tpu.memory_space<vmem>>, vector<64x1xi32>
    %1 = tpu.iota {dimensions = array<i32: 1>} : vector<64x24xi32>
    %2 = vector.broadcast %0 : vector<64x1xi32> to vector<64x24xi32>
    %3 = arith.cmpi eq, %1, %2 : vector<64x24xi32>
    %4 = arith.extui %3 : vector<64x24xi1> to vector<64x24xi32>
    %5 = arith.sitofp %4 : vector<64x24xi32> to vector<64x24xf32>
    %c0_1 = arith.constant 0 : index
    %c0_2 = arith.constant 0 : index
    %6 = vector.load %arg1[%c0_1, %c0_2] : memref<24x96xf32, #tpu.memory_space<vmem>>, vector<24x96xf32>
    %cst = arith.constant dense<0.000000e+00> : vector<64x96xf32>
    %7 = tpu.matmul %5, %6, %cst {dimension_numbers = #tpu.dot_dimension_numbers<[1], [0], [0], [1], [0, 0, 1, 1], [], []>} : vector<64x24xf32>, vector<24x96xf32>, vector<64x96xf32> -> vector<64x96xf32>
    %8 = vector.extract_strided_slice %7 {offsets = [0, 0], sizes = [64, 32], strides = [1, 1]} : vector<64x96xf32> to vector<64x32xf32>
    %9 = vector.extract_strided_slice %7 {offsets = [0, 32], sizes = [64, 32], strides = [1, 1]} : vector<64x96xf32> to vector<64x32xf32>
    %10 = vector.extract_strided_slice %7 {offsets = [0, 64], sizes = [64, 32], strides = [1, 1]} : vector<64x96xf32> to vector<64x32xf32>
    %c0_3 = arith.constant 0 : index
    %c0_4 = arith.constant 0 : index
    %11 = vector.load %arg2[%c0_3, %c0_4] : memref<32x96xf32, #tpu.memory_space<vmem>>, vector<32x96xf32>
    %c0_5 = arith.constant 0 : index
    %c0_6 = arith.constant 0 : index
    %12 = vector.load %arg3[%c0_5, %c0_6] : memref<1x32xf32, #tpu.memory_space<vmem>>, vector<1x32xf32>
    %13 = vector.shape_cast %12 : vector<1x32xf32> to vector<1x32xf32>
    %14 = vector.broadcast %13 : vector<1x32xf32> to vector<8x32xf32>
    %cst_7 = arith.constant 0.000000e+00 : f32
    %15 = vector.broadcast %cst_7 : f32 to vector<8x32xf32>
    %cst_8 = arith.constant dense<0.000000e+00> : vector<8x96xf32>
    %16 = tpu.matmul %15, %11, %cst_8 {dimension_numbers = #tpu.dot_dimension_numbers<[1], [0], [0], [1], [0, 0, 1, 1], [], []>} : vector<8x32xf32>, vector<32x96xf32>, vector<8x96xf32> -> vector<8x96xf32>
    %17 = vector.extract_strided_slice %8 {offsets = [0, 0], sizes = [8, 32], strides = [1, 1]} : vector<64x32xf32> to vector<8x32xf32>
    %18 = vector.extract_strided_slice %16 {offsets = [0, 0], sizes = [8, 32], strides = [1, 1]} : vector<8x96xf32> to vector<8x32xf32>
    %19 = arith.addf %17, %18 : vector<8x32xf32>
    %20 = arith.negf %19 : vector<8x32xf32>
    %21 = math.exp %20 : vector<8x32xf32>
    %cst_9 = arith.constant 1.000000e+00 : f32
    %22 = vector.broadcast %cst_9 : f32 to vector<8x32xf32>
    %23 = arith.addf %22, %21 : vector<8x32xf32>
    %24 = arith.divf %22, %23 : vector<8x32xf32>
    %25 = vector.extract_strided_slice %9 {offsets = [0, 0], sizes = [8, 32], strides = [1, 1]} : vector<64x32xf32> to vector<8x32xf32>
    %26 = vector.extract_strided_slice %16 {offsets = [0, 32], sizes = [8, 32], strides = [1, 1]} : vector<8x96xf32> to vector<8x32xf32>
    %27 = arith.addf %25, %26 : vector<8x32xf32>
    %28 = arith.negf %27 : vector<8x32xf32>
    %29 = math.exp %28 : vector<8x32xf32>
    %cst_10 = arith.constant 1.000000e+00 : f32
    %30 = vector.broadcast %cst_10 : f32 to vector<8x32xf32>
    %31 = arith.addf %30, %29 : vector<8x32xf32>
    %32 = arith.divf %30, %31 : vector<8x32xf32>
    %33 = vector.extract_strided_slice %10 {offsets = [0, 0], sizes = [8, 32], strides = [1, 1]} : vector<64x32xf32> to vector<8x32xf32>
    %34 = vector.extract_strided_slice %16 {offsets = [0, 64], sizes = [8, 32], strides = [1, 1]} : vector<8x96xf32> to vector<8x32xf32>
    %35 = arith.addf %34, %14 : vector<8x32xf32>
    %36 = arith.mulf %24, %35 : vector<8x32xf32>
    %37 = arith.addf %33, %36 : vector<8x32xf32>
    %38 = math.tanh %37 : vector<8x32xf32>
    %39 = arith.subf %15, %38 : vector<8x32xf32>
    %40 = arith.mulf %32, %39 : vector<8x32xf32>
    %41 = arith.addf %38, %40 : vector<8x32xf32>
    %cst_11 = arith.constant dense<0.000000e+00> : vector<8x96xf32>
    %42 = tpu.matmul %41, %11, %cst_11 {dimension_numbers = #tpu.dot_dimension_numbers<[1], [0], [0], [1], [0, 0, 1, 1], [], []>} : vector<8x32xf32>, vector<32x96xf32>, vector<8x96xf32> -> vector<8x96xf32>
    %43 = vector.extract_strided_slice %8 {offsets = [8, 0], sizes = [8, 32], strides = [1, 1]} : vector<64x32xf32> to vector<8x32xf32>
    %44 = vector.extract_strided_slice %42 {offsets = [0, 0], sizes = [8, 32], strides = [1, 1]} : vector<8x96xf32> to vector<8x32xf32>
    %45 = arith.addf %43, %44 : vector<8x32xf32>
    %46 = arith.negf %45 : vector<8x32xf32>
    %47 = math.exp %46 : vector<8x32xf32>
    %cst_12 = arith.constant 1.000000e+00 : f32
    %48 = vector.broadcast %cst_12 : f32 to vector<8x32xf32>
    %49 = arith.addf %48, %47 : vector<8x32xf32>
    %50 = arith.divf %48, %49 : vector<8x32xf32>
    %51 = vector.extract_strided_slice %9 {offsets = [8, 0], sizes = [8, 32], strides = [1, 1]} : vector<64x32xf32> to vector<8x32xf32>
    %52 = vector.extract_strided_slice %42 {offsets = [0, 32], sizes = [8, 32], strides = [1, 1]} : vector<8x96xf32> to vector<8x32xf32>
    %53 = arith.addf %51, %52 : vector<8x32xf32>
    %54 = arith.negf %53 : vector<8x32xf32>
    %55 = math.exp %54 : vector<8x32xf32>
    %cst_13 = arith.constant 1.000000e+00 : f32
    %56 = vector.broadcast %cst_13 : f32 to vector<8x32xf32>
    %57 = arith.addf %56, %55 : vector<8x32xf32>
    %58 = arith.divf %56, %57 : vector<8x32xf32>
    %59 = vector.extract_strided_slice %10 {offsets = [8, 0], sizes = [8, 32], strides = [1, 1]} : vector<64x32xf32> to vector<8x32xf32>
    %60 = vector.extract_strided_slice %42 {offsets = [0, 64], sizes = [8, 32], strides = [1, 1]} : vector<8x96xf32> to vector<8x32xf32>
    %61 = arith.addf %60, %14 : vector<8x32xf32>
    %62 = arith.mulf %50, %61 : vector<8x32xf32>
    %63 = arith.addf %59, %62 : vector<8x32xf32>
    %64 = math.tanh %63 : vector<8x32xf32>
    %65 = arith.subf %41, %64 : vector<8x32xf32>
    %66 = arith.mulf %58, %65 : vector<8x32xf32>
    %67 = arith.addf %64, %66 : vector<8x32xf32>
    %cst_14 = arith.constant dense<0.000000e+00> : vector<8x96xf32>
    %68 = tpu.matmul %67, %11, %cst_14 {dimension_numbers = #tpu.dot_dimension_numbers<[1], [0], [0], [1], [0, 0, 1, 1], [], []>} : vector<8x32xf32>, vector<32x96xf32>, vector<8x96xf32> -> vector<8x96xf32>
    %69 = vector.extract_strided_slice %8 {offsets = [16, 0], sizes = [8, 32], strides = [1, 1]} : vector<64x32xf32> to vector<8x32xf32>
    %70 = vector.extract_strided_slice %68 {offsets = [0, 0], sizes = [8, 32], strides = [1, 1]} : vector<8x96xf32> to vector<8x32xf32>
    %71 = arith.addf %69, %70 : vector<8x32xf32>
    %72 = arith.negf %71 : vector<8x32xf32>
    %73 = math.exp %72 : vector<8x32xf32>
    %cst_15 = arith.constant 1.000000e+00 : f32
    %74 = vector.broadcast %cst_15 : f32 to vector<8x32xf32>
    %75 = arith.addf %74, %73 : vector<8x32xf32>
    %76 = arith.divf %74, %75 : vector<8x32xf32>
    %77 = vector.extract_strided_slice %9 {offsets = [16, 0], sizes = [8, 32], strides = [1, 1]} : vector<64x32xf32> to vector<8x32xf32>
    %78 = vector.extract_strided_slice %68 {offsets = [0, 32], sizes = [8, 32], strides = [1, 1]} : vector<8x96xf32> to vector<8x32xf32>
    %79 = arith.addf %77, %78 : vector<8x32xf32>
    %80 = arith.negf %79 : vector<8x32xf32>
    %81 = math.exp %80 : vector<8x32xf32>
    %cst_16 = arith.constant 1.000000e+00 : f32
    %82 = vector.broadcast %cst_16 : f32 to vector<8x32xf32>
    %83 = arith.addf %82, %81 : vector<8x32xf32>
    %84 = arith.divf %82, %83 : vector<8x32xf32>
    %85 = vector.extract_strided_slice %10 {offsets = [16, 0], sizes = [8, 32], strides = [1, 1]} : vector<64x32xf32> to vector<8x32xf32>
    %86 = vector.extract_strided_slice %68 {offsets = [0, 64], sizes = [8, 32], strides = [1, 1]} : vector<8x96xf32> to vector<8x32xf32>
    %87 = arith.addf %86, %14 : vector<8x32xf32>
    %88 = arith.mulf %76, %87 : vector<8x32xf32>
    %89 = arith.addf %85, %88 : vector<8x32xf32>
    %90 = math.tanh %89 : vector<8x32xf32>
    %91 = arith.subf %67, %90 : vector<8x32xf32>
    %92 = arith.mulf %84, %91 : vector<8x32xf32>
    %93 = arith.addf %90, %92 : vector<8x32xf32>
    %cst_17 = arith.constant dense<0.000000e+00> : vector<8x96xf32>
    %94 = tpu.matmul %93, %11, %cst_17 {dimension_numbers = #tpu.dot_dimension_numbers<[1], [0], [0], [1], [0, 0, 1, 1], [], []>} : vector<8x32xf32>, vector<32x96xf32>, vector<8x96xf32> -> vector<8x96xf32>
    %95 = vector.extract_strided_slice %8 {offsets = [24, 0], sizes = [8, 32], strides = [1, 1]} : vector<64x32xf32> to vector<8x32xf32>
    %96 = vector.extract_strided_slice %94 {offsets = [0, 0], sizes = [8, 32], strides = [1, 1]} : vector<8x96xf32> to vector<8x32xf32>
    %97 = arith.addf %95, %96 : vector<8x32xf32>
    %98 = arith.negf %97 : vector<8x32xf32>
    %99 = math.exp %98 : vector<8x32xf32>
    %cst_18 = arith.constant 1.000000e+00 : f32
    %100 = vector.broadcast %cst_18 : f32 to vector<8x32xf32>
    %101 = arith.addf %100, %99 : vector<8x32xf32>
    %102 = arith.divf %100, %101 : vector<8x32xf32>
    %103 = vector.extract_strided_slice %9 {offsets = [24, 0], sizes = [8, 32], strides = [1, 1]} : vector<64x32xf32> to vector<8x32xf32>
    %104 = vector.extract_strided_slice %94 {offsets = [0, 32], sizes = [8, 32], strides = [1, 1]} : vector<8x96xf32> to vector<8x32xf32>
    %105 = arith.addf %103, %104 : vector<8x32xf32>
    %106 = arith.negf %105 : vector<8x32xf32>
    %107 = math.exp %106 : vector<8x32xf32>
    %cst_19 = arith.constant 1.000000e+00 : f32
    %108 = vector.broadcast %cst_19 : f32 to vector<8x32xf32>
    %109 = arith.addf %108, %107 : vector<8x32xf32>
    %110 = arith.divf %108, %109 : vector<8x32xf32>
    %111 = vector.extract_strided_slice %10 {offsets = [24, 0], sizes = [8, 32], strides = [1, 1]} : vector<64x32xf32> to vector<8x32xf32>
    %112 = vector.extract_strided_slice %94 {offsets = [0, 64], sizes = [8, 32], strides = [1, 1]} : vector<8x96xf32> to vector<8x32xf32>
    %113 = arith.addf %112, %14 : vector<8x32xf32>
    %114 = arith.mulf %102, %113 : vector<8x32xf32>
    %115 = arith.addf %111, %114 : vector<8x32xf32>
    %116 = math.tanh %115 : vector<8x32xf32>
    %117 = arith.subf %93, %116 : vector<8x32xf32>
    %118 = arith.mulf %110, %117 : vector<8x32xf32>
    %119 = arith.addf %116, %118 : vector<8x32xf32>
    %cst_20 = arith.constant dense<0.000000e+00> : vector<8x96xf32>
    %120 = tpu.matmul %119, %11, %cst_20 {dimension_numbers = #tpu.dot_dimension_numbers<[1], [0], [0], [1], [0, 0, 1, 1], [], []>} : vector<8x32xf32>, vector<32x96xf32>, vector<8x96xf32> -> vector<8x96xf32>
    %121 = vector.extract_strided_slice %8 {offsets = [32, 0], sizes = [8, 32], strides = [1, 1]} : vector<64x32xf32> to vector<8x32xf32>
    %122 = vector.extract_strided_slice %120 {offsets = [0, 0], sizes = [8, 32], strides = [1, 1]} : vector<8x96xf32> to vector<8x32xf32>
    %123 = arith.addf %121, %122 : vector<8x32xf32>
    %124 = arith.negf %123 : vector<8x32xf32>
    %125 = math.exp %124 : vector<8x32xf32>
    %cst_21 = arith.constant 1.000000e+00 : f32
    %126 = vector.broadcast %cst_21 : f32 to vector<8x32xf32>
    %127 = arith.addf %126, %125 : vector<8x32xf32>
    %128 = arith.divf %126, %127 : vector<8x32xf32>
    %129 = vector.extract_strided_slice %9 {offsets = [32, 0], sizes = [8, 32], strides = [1, 1]} : vector<64x32xf32> to vector<8x32xf32>
    %130 = vector.extract_strided_slice %120 {offsets = [0, 32], sizes = [8, 32], strides = [1, 1]} : vector<8x96xf32> to vector<8x32xf32>
    %131 = arith.addf %129, %130 : vector<8x32xf32>
    %132 = arith.negf %131 : vector<8x32xf32>
    %133 = math.exp %132 : vector<8x32xf32>
    %cst_22 = arith.constant 1.000000e+00 : f32
    %134 = vector.broadcast %cst_22 : f32 to vector<8x32xf32>
    %135 = arith.addf %134, %133 : vector<8x32xf32>
    %136 = arith.divf %134, %135 : vector<8x32xf32>
    %137 = vector.extract_strided_slice %10 {offsets = [32, 0], sizes = [8, 32], strides = [1, 1]} : vector<64x32xf32> to vector<8x32xf32>
    %138 = vector.extract_strided_slice %120 {offsets = [0, 64], sizes = [8, 32], strides = [1, 1]} : vector<8x96xf32> to vector<8x32xf32>
    %139 = arith.addf %138, %14 : vector<8x32xf32>
    %140 = arith.mulf %128, %139 : vector<8x32xf32>
    %141 = arith.addf %137, %140 : vector<8x32xf32>
    %142 = math.tanh %141 : vector<8x32xf32>
    %143 = arith.subf %119, %142 : vector<8x32xf32>
    %144 = arith.mulf %136, %143 : vector<8x32xf32>
    %145 = arith.addf %142, %144 : vector<8x32xf32>
    %cst_23 = arith.constant dense<0.000000e+00> : vector<8x96xf32>
    %146 = tpu.matmul %145, %11, %cst_23 {dimension_numbers = #tpu.dot_dimension_numbers<[1], [0], [0], [1], [0, 0, 1, 1], [], []>} : vector<8x32xf32>, vector<32x96xf32>, vector<8x96xf32> -> vector<8x96xf32>
    %147 = vector.extract_strided_slice %8 {offsets = [40, 0], sizes = [8, 32], strides = [1, 1]} : vector<64x32xf32> to vector<8x32xf32>
    %148 = vector.extract_strided_slice %146 {offsets = [0, 0], sizes = [8, 32], strides = [1, 1]} : vector<8x96xf32> to vector<8x32xf32>
    %149 = arith.addf %147, %148 : vector<8x32xf32>
    %150 = arith.negf %149 : vector<8x32xf32>
    %151 = math.exp %150 : vector<8x32xf32>
    %cst_24 = arith.constant 1.000000e+00 : f32
    %152 = vector.broadcast %cst_24 : f32 to vector<8x32xf32>
    %153 = arith.addf %152, %151 : vector<8x32xf32>
    %154 = arith.divf %152, %153 : vector<8x32xf32>
    %155 = vector.extract_strided_slice %9 {offsets = [40, 0], sizes = [8, 32], strides = [1, 1]} : vector<64x32xf32> to vector<8x32xf32>
    %156 = vector.extract_strided_slice %146 {offsets = [0, 32], sizes = [8, 32], strides = [1, 1]} : vector<8x96xf32> to vector<8x32xf32>
    %157 = arith.addf %155, %156 : vector<8x32xf32>
    %158 = arith.negf %157 : vector<8x32xf32>
    %159 = math.exp %158 : vector<8x32xf32>
    %cst_25 = arith.constant 1.000000e+00 : f32
    %160 = vector.broadcast %cst_25 : f32 to vector<8x32xf32>
    %161 = arith.addf %160, %159 : vector<8x32xf32>
    %162 = arith.divf %160, %161 : vector<8x32xf32>
    %163 = vector.extract_strided_slice %10 {offsets = [40, 0], sizes = [8, 32], strides = [1, 1]} : vector<64x32xf32> to vector<8x32xf32>
    %164 = vector.extract_strided_slice %146 {offsets = [0, 64], sizes = [8, 32], strides = [1, 1]} : vector<8x96xf32> to vector<8x32xf32>
    %165 = arith.addf %164, %14 : vector<8x32xf32>
    %166 = arith.mulf %154, %165 : vector<8x32xf32>
    %167 = arith.addf %163, %166 : vector<8x32xf32>
    %168 = math.tanh %167 : vector<8x32xf32>
    %169 = arith.subf %145, %168 : vector<8x32xf32>
    %170 = arith.mulf %162, %169 : vector<8x32xf32>
    %171 = arith.addf %168, %170 : vector<8x32xf32>
    %cst_26 = arith.constant dense<0.000000e+00> : vector<8x96xf32>
    %172 = tpu.matmul %171, %11, %cst_26 {dimension_numbers = #tpu.dot_dimension_numbers<[1], [0], [0], [1], [0, 0, 1, 1], [], []>} : vector<8x32xf32>, vector<32x96xf32>, vector<8x96xf32> -> vector<8x96xf32>
    %173 = vector.extract_strided_slice %8 {offsets = [48, 0], sizes = [8, 32], strides = [1, 1]} : vector<64x32xf32> to vector<8x32xf32>
    %174 = vector.extract_strided_slice %172 {offsets = [0, 0], sizes = [8, 32], strides = [1, 1]} : vector<8x96xf32> to vector<8x32xf32>
    %175 = arith.addf %173, %174 : vector<8x32xf32>
    %176 = arith.negf %175 : vector<8x32xf32>
    %177 = math.exp %176 : vector<8x32xf32>
    %cst_27 = arith.constant 1.000000e+00 : f32
    %178 = vector.broadcast %cst_27 : f32 to vector<8x32xf32>
    %179 = arith.addf %178, %177 : vector<8x32xf32>
    %180 = arith.divf %178, %179 : vector<8x32xf32>
    %181 = vector.extract_strided_slice %9 {offsets = [48, 0], sizes = [8, 32], strides = [1, 1]} : vector<64x32xf32> to vector<8x32xf32>
    %182 = vector.extract_strided_slice %172 {offsets = [0, 32], sizes = [8, 32], strides = [1, 1]} : vector<8x96xf32> to vector<8x32xf32>
    %183 = arith.addf %181, %182 : vector<8x32xf32>
    %184 = arith.negf %183 : vector<8x32xf32>
    %185 = math.exp %184 : vector<8x32xf32>
    %cst_28 = arith.constant 1.000000e+00 : f32
    %186 = vector.broadcast %cst_28 : f32 to vector<8x32xf32>
    %187 = arith.addf %186, %185 : vector<8x32xf32>
    %188 = arith.divf %186, %187 : vector<8x32xf32>
    %189 = vector.extract_strided_slice %10 {offsets = [48, 0], sizes = [8, 32], strides = [1, 1]} : vector<64x32xf32> to vector<8x32xf32>
    %190 = vector.extract_strided_slice %172 {offsets = [0, 64], sizes = [8, 32], strides = [1, 1]} : vector<8x96xf32> to vector<8x32xf32>
    %191 = arith.addf %190, %14 : vector<8x32xf32>
    %192 = arith.mulf %180, %191 : vector<8x32xf32>
    %193 = arith.addf %189, %192 : vector<8x32xf32>
    %194 = math.tanh %193 : vector<8x32xf32>
    %195 = arith.subf %171, %194 : vector<8x32xf32>
    %196 = arith.mulf %188, %195 : vector<8x32xf32>
    %197 = arith.addf %194, %196 : vector<8x32xf32>
    %cst_29 = arith.constant dense<0.000000e+00> : vector<8x96xf32>
    %198 = tpu.matmul %197, %11, %cst_29 {dimension_numbers = #tpu.dot_dimension_numbers<[1], [0], [0], [1], [0, 0, 1, 1], [], []>} : vector<8x32xf32>, vector<32x96xf32>, vector<8x96xf32> -> vector<8x96xf32>
    %199 = vector.extract_strided_slice %8 {offsets = [56, 0], sizes = [8, 32], strides = [1, 1]} : vector<64x32xf32> to vector<8x32xf32>
    %200 = vector.extract_strided_slice %198 {offsets = [0, 0], sizes = [8, 32], strides = [1, 1]} : vector<8x96xf32> to vector<8x32xf32>
    %201 = arith.addf %199, %200 : vector<8x32xf32>
    %202 = arith.negf %201 : vector<8x32xf32>
    %203 = math.exp %202 : vector<8x32xf32>
    %cst_30 = arith.constant 1.000000e+00 : f32
    %204 = vector.broadcast %cst_30 : f32 to vector<8x32xf32>
    %205 = arith.addf %204, %203 : vector<8x32xf32>
    %206 = arith.divf %204, %205 : vector<8x32xf32>
    %207 = vector.extract_strided_slice %9 {offsets = [56, 0], sizes = [8, 32], strides = [1, 1]} : vector<64x32xf32> to vector<8x32xf32>
    %208 = vector.extract_strided_slice %198 {offsets = [0, 32], sizes = [8, 32], strides = [1, 1]} : vector<8x96xf32> to vector<8x32xf32>
    %209 = arith.addf %207, %208 : vector<8x32xf32>
    %210 = arith.negf %209 : vector<8x32xf32>
    %211 = math.exp %210 : vector<8x32xf32>
    %cst_31 = arith.constant 1.000000e+00 : f32
    %212 = vector.broadcast %cst_31 : f32 to vector<8x32xf32>
    %213 = arith.addf %212, %211 : vector<8x32xf32>
    %214 = arith.divf %212, %213 : vector<8x32xf32>
    %215 = vector.extract_strided_slice %10 {offsets = [56, 0], sizes = [8, 32], strides = [1, 1]} : vector<64x32xf32> to vector<8x32xf32>
    %216 = vector.extract_strided_slice %198 {offsets = [0, 64], sizes = [8, 32], strides = [1, 1]} : vector<8x96xf32> to vector<8x32xf32>
    %217 = arith.addf %216, %14 : vector<8x32xf32>
    %218 = arith.mulf %206, %217 : vector<8x32xf32>
    %219 = arith.addf %215, %218 : vector<8x32xf32>
    %220 = math.tanh %219 : vector<8x32xf32>
    %221 = arith.subf %197, %220 : vector<8x32xf32>
    %222 = arith.mulf %214, %221 : vector<8x32xf32>
    %223 = arith.addf %220, %222 : vector<8x32xf32>
    %224 = vector.extract_strided_slice %223 {offsets = [0, 0], sizes = [2, 32], strides = [1, 1]} : vector<8x32xf32> to vector<2x32xf32>
    %c0_32 = arith.constant 0 : index
    %c0_33 = arith.constant 0 : index
    %225 = vector.load %arg4[%c0_32, %c0_33] : memref<2x32xf32, #tpu.memory_space<vmem>>, vector<2x32xf32>
    tpu.vector_store %arg4[%c0_32, %c0_33], %224 {strides = array<i32>} : memref<2x32xf32, #tpu.memory_space<vmem>>, vector<2x32xf32>,
    return
  }
}

</mosaic_0001>

<bundles_post_ra>
// kernel: gru_encoder_forward.1
= control target key start
LH: loop header
LB: loop body
LE: loop exit
PB: predicated region body
PF: predicated region fallthrough
CT: control target
= control target key end

     0   :  { %v1404_v2 = vmov 0   ;;  %v1405_v3 = vmov 0.0|0.0   ;;  %vm1406_vm0 = vmmov 0   ;;  %v1407_v8 = vmov 0.0   ;;  %s1650_s0 = inlined_call_operand.vmem [shape: s32[64,1], index: 0, kind: input, shape index: {}]   ;;  %s1651_s1 = inlined_call_operand.vmem [shape: f32[24,96], index: 1, kind: input, shape index: {}]   ;;  %s1652_s2 = inlined_call_operand.vmem [shape: f32[32,96], index: 2, kind: input, shape index: {}]   ;;  %s1653_s3 = inlined_call_operand.vmem [shape: f32[1,32], index: 3, kind: input, shape index: {}]   ;;  %s1654_s4 = inlined_call_operand.hbm [shape: f32[2,32], index: 4, kind: output, shape index: {}]  }
   0x1   :  { %v18_v0 = vld [vmem:[%s1650_s0] sm:$0xff]  ;;  %1330 = vset.pattern.permute.xlu0 %v1404_v2  ;;  %1274 = vmatprep.subr.bf16.mxu1 %v1405_v3  ;;  %v210_v4 = vld [vmem:[%s1652_s2 + $0x8] sm:$0xff]  ;;  %v211_v5 = vld [vmem:[%s1652_s2 + $0x10] sm:$0xff] }
   0x2   :  { %v209_v1 = vld [vmem:[%s1652_s2] sm:$0xff]  ;;  %v212_v6 = vld [vmem:[%s1652_s2 + $0x18] sm:$0xff]  ;;  %29 = vperm.xlu0 %1330, %v18_v0   ;;  %1190 = vmatprep.mubr.msk.f32.mxu1 %vm1406_vm0, %v1407_v8  ;;  %v77_v10 = vld [vmem:[%s1651_s1 + $0x8] sm:$0xff] }
   0x3   :  { %v1453_v7 = vpack.c.bf16 %v210_v4, %v209_v1  ;;  %v76_v9 = vld [vmem:[%s1651_s1] sm:$0xff] }
   0x4   :  { %9 = vsyncpa [#allocation3], 0  ;;  %v19_v11 = vld [vmem:[%s1650_s0 + $0x8] sm:$0xff]  ;;  %v1270_v12 = vpack.c.bf16 %v77_v10, %v76_v9  ;;  %1331 = vset.pattern.permute.xlu1 %v1404_v2  ;;  %v1467_v13 = vpack.c.bf16 %v212_v6, %v211_v5  ;;  %v78_v14 = vld [vmem:[%s1651_s1 + $0x10] sm:$0xff]  ;;  %s1408_s8 = smov 64   ;;  %v26_v16 = vlaneseq  ;;  %vm79_vm1 = vcmask 195584  }
   0x5   :  { %1276 = vmatpush3.bf16.msra.mxu1 %v1453_v7  ;;  %v1097_v15 = vld [vmem:[%s1653_s3] ss:$0 sm:$0xff]  ;;  %s1409_s1 = smov 96   ;;  %s1410_s3 = smov 32   ;;  %vm219_vm4 = vcmask 261120   ;;  %v20_v58 = vld [vmem:[%s1650_s0 + $0x10] sm:$0xff] }
   0x6   :  { %1277 = vmatprep.subr.bf16.mxu1 %v1405_v3  ;;  %1271 = vmatprep.subr.bf16.mxu0 %v1270_v12  ;;  %v1487_v17 = vand.u32 127, %v26_v16  ;;  %v22_v59 = vld [vmem:[%s1650_s0 + $0x20] sm:$0xff]  ;;  %v24_v60 = vld [vmem:[%s1650_s0 + $0x30] sm:$0xff]  ;;  %v21_v63 = vld [vmem:[%s1650_s0 + $0x18] sm:$0xff]  ;;  %vm1065_vm11 = vcmask 254976  }
   0x7   :  { %32 = vperm.xlu0 %1330, %v19_v11   ;;  %1273 = vmatpush3.bf16.msra.mxu0 %v1270_v12  ;;  %v23_v0 = vld [vmem:[%s1650_s0 + $0x28] sm:$0xff]  ;;  %v25_v1 = vld [vmem:[%s1650_s0 + $0x38] sm:$0xff]  ;;  %s1411_s0 = smov [#allocation2]  }
   0x8   :  { %1168 = vmatprep.subr.mxu0 %v78_v14  ;;  %300 = vrot.lane.b32.xlu1 %v1097_v15, %s1408_s8  ;;  %s1073_s21 = sshll.u32 %s1411_s0, 4  ;;  %s1074_s21 = int_to_ptr.vmem [resolvable:$true] %s1073_s21 }
   0x9   :  { %1279 = vmatpush3.bf16.msra.mxu1 %v1467_v13  ;;  %s1380_s22 = scalar_lea.vmem %s1074_s21, 32  ;;  %p1385_p1 = scmp.lt.s32.totalorder %s1074_s21, %s1074_s21 }
   0xa   :  { %1280 = vmatprep.subr.bf16.mxu1 %v1405_v3  ;;  %p1381_p0 = scmp.ne.s32.totalorder %s1074_s21, %s1380_s22  ;;  %p1386_p2 = scmp.lt.s32.totalorder %s1380_s22, %s1380_s22 }
   0xb   :  { %1169 = vmatpush3.msra.mxu0 %v78_v14 }
   0xc   :  { %1191 = vmatmul.mubr.f32.vlgmr.msra.gmra.mrb[0].mxu1 %v1407_v8  ;;  %1286 = vmatprep.subr.bf16.mxu0 %v1405_v3  ;;  %p1387_p3 = por %p1386_p2, %p1385_p1 }
   0xd   :  { %1282 = vmatpush3.bf16.msra.mxu1 %v1453_v7  ;;  %1201 = vmatprep.mubr.msk.f32.mxu1 %vm1406_vm0, %v1407_v8 }
   0xe   :  { %1283 = vmatprep.subr.bf16.mxu1 %v1405_v3  ;;  %p1388_p4 = pnand %p1387_p3, %p1381_p0 }
  0x11   :  { %1285 = vmatpush3.bf16.msra.mxu1 %v1467_v13 }
  0x12   :  { %1292 = vmatprep.subr.bf16.mxu1 %v1405_v3 }
  0x7a   :  { %v1499_v22 = vpop.permute.xlu1 %300 }
  0x81   :  { %v30_v18 = vpop.permute.xlu0 %29 }
  0x82   :  { %vm52_vm2 = vcmp.eq.s32.totalorder %v1487_v17, %v30_v18 }
  0x83   :  { %v1081_v19 = vsel %vm52_vm2, 1.0, %v1407_v8 }
  0x84   :  { %1170 = vmatprep.mubr.msk.f32.mxu0 %vm79_vm1, %v1081_v19 }
  0x86   :  { %v33_v20 = vpop.permute.xlu0 %32 }
  0x87   :  { %vm53_vm3 = vcmp.eq.s32.totalorder %v1487_v17, %v33_v20 }
  0x88   :  { %v1082_v21 = vsel %vm53_vm3, 1.0, %v1407_v8 }
  0x89   :  { %1171 = vmatmul.mubr.msk.f32.vlgmr.msra.gmra.mrb[0].mxu0 %vm79_vm1, %v1082_v21 }
  0x8a   :  { %1288 = vmatpush3.bf16.msra.mxu0 %v1453_v7 }
  0x8b   :  { %1289 = vmatprep.subr.bf16.mxu0 %v1405_v3 }
  0x8e   :  { %1291 = vmatpush3.bf16.msra.mxu0 %v1467_v13 }
  0x8f   :  { %1298 = vmatprep.subr.bf16.mxu0 %v1405_v3 }
  0xdf   :  { %v289_v23 = vpop.f32.mrb[0].mxu1 }
  0xe0   :  { %v1192_v24 = vpop.f32.mrb[1].mxu1  ;;  %v303_v25 = vadd.f32 %v1499_v22, %v289_v23 }
  0xe2   :  { %305 = vrot.lane.b32.xlu1 %v303_v25, %s1408_s8 }
 0x154   :  { %v306_v32 = vpop.permute.xlu1 %305 }
 0x15c   :  { %v1172_v26 = vpop.f32.mrb[0].mxu0 }
 0x15d   :  { %v170_v27 = vpop.f32.mrb[1].mxu0 }
 0x15e   :  { %v293_v28 = vadd.f32 %v289_v23, %v170_v27 }
 0x160   :  { %v1098_v29 = vmul.f32 -1.442695, %v293_v28 }
 0x162   :  { %1332 = vpow2.f32 %v1098_v29 }
 0x16c   :  { %v1333_v30 = vpop.eup %1332 }
 0x16d   :  { %v297_v31 = vadd.f32 1.0, %v1333_v30 }
 0x16f   :  { %1334 = vrcp.f32 %v297_v31 }
 0x179   :  { %v1335_v33 = vpop.eup %1334 }
 0x17a   :  { %v308_v34 = vmul.f32 %v1335_v33, %v306_v32 }
 0x17c   :  { %310 = vrot.lane.b32.xlu0 %v308_v34, %s1408_s8 }
 0x1ee   :  { %v311_v35 = vpop.permute.xlu0 %310 }
 0x1ef   :  { %v313_v36 = vadd.f32 %v311_v35, %v170_v27 }
 0x1f1   :  { %1336 = vtanh.f32 %v313_v36 }
 0x1fb   :  { %v1337_v37 = vpop.eup %1336 }
 0x1fc   :  { %v315_v38 = vsub.f32 0.0, %v1337_v37 }
 0x1fe   :  { %317 = vrot.lane.b32.xlu1 %v315_v38, %s1409_s1 }
 0x270   :  { %v318_v39 = vpop.permute.xlu1 %317 }
 0x271   :  { %v320_v40 = vmul.f32 %v1335_v33, %v318_v39 }
 0x273   :  { %322 = vrot.lane.b32.xlu0 %v320_v40, %s1410_s3 }
 0x2e5   :  { %v323_v41 = vpop.permute.xlu0 %322 }
 0x2e6   :  { %v325_v42 = vadd.f32 %v1337_v37, %v323_v41 }
 0x2e8   :  { %327 = vrot.lane.b32.xlu1 %v325_v42, %s1408_s8 }
 0x35a   :  { %v328_v43 = vpop.permute.xlu1 %327 }
 0x35b   :  { %1202 = vmatmul.mubr.msk.f32.vlgmr.msra.gmra.mrb[2].mxu1 %vm219_vm4, %v328_v43 }
 0x35c   :  { %1294 = vmatpush3.bf16.msra.mxu1 %v1453_v7  ;;  %1223 = vmatprep.mubr.msk.f32.mxu1 %vm1406_vm0, %v1407_v8 }
 0x35d   :  { %1295 = vmatprep.subr.bf16.mxu1 %v1405_v3 }
 0x360   :  { %1297 = vmatpush3.bf16.msra.mxu1 %v1467_v13 }
 0x361   :  { %1304 = vmatprep.subr.bf16.mxu1 %v1405_v3 }
 0x42e   :  { %v397_v44 = vpop.f32.mrb[2].mxu1 }
 0x42f   :  { %v401_v45 = vadd.f32 %v1172_v26, %v397_v44  ;;  %v408_v46 = vadd.f32 %v397_v44, %v1499_v22  ;;  %v1203_v47 = vpop.f32.mrb[3].mxu1 }
 0x431   :  { %410 = vrot.lane.b32.xlu0 %v408_v46, %s1408_s8  ;;  %v1100_v48 = vmul.f32 -1.442695, %v401_v45 }
 0x433   :  { %1338 = vpow2.f32 %v1100_v48 }
 0x43d   :  { %v1339_v49 = vpop.eup %1338 }
 0x43e   :  { %v405_v50 = vadd.f32 1.0, %v1339_v49 }
 0x440   :  { %1340 = vrcp.f32 %v405_v50 }
 0x44a   :  { %v1341_v51 = vpop.eup %1340 }
 0x4a3   :  { %v411_v52 = vpop.permute.xlu0 %410 }
 0x4a4   :  { %v413_v53 = vmul.f32 %v1341_v51, %v411_v52 }
 0x4a6   :  { %415 = vrot.lane.b32.xlu1 %v413_v53, %s1408_s8 }
 0x518   :  { %v416_v54 = vpop.permute.xlu1 %415 }
 0x519   :  { %v418_v55 = vadd.f32 %v1172_v26, %v416_v54 }
 0x51b   :  { %1342 = vtanh.f32 %v418_v55 }
 0x525   :  { %v1343_v56 = vpop.eup %1342 }
 0x526   :  { %v420_v57 = vsub.f32 %v325_v42, %v1343_v56 }
 0x528   :  { %422 = vrot.lane.b32.xlu0 %v420_v57, %s1409_s1 }
 0x52c   :  { %35 = vperm.xlu0 %1330, %v20_v58  }
 0x530   :  { %41 = vperm.xlu0 %1330, %v22_v59  }
 0x534   :  { %47 = vperm.xlu0 %1330, %v24_v60  }
 0x59a   :  { %v423_v61 = vpop.permute.xlu0 %422 }
 0x59b   :  { %v425_v62 = vmul.f32 %v1341_v51, %v423_v61 }
 0x59d   :  { %427 = vrot.lane.b32.xlu1 %v425_v62, %s1410_s3 }
 0x5a1   :  { %38 = vperm.xlu1 %1331, %v21_v63  }
 0x5a5   :  { %44 = vperm.xlu1 %1331, %v23_v0  }
 0x5a9   :  { %50 = vperm.xlu1 %1331, %v25_v1  }
 0x5ab   :  { %v36_v2 = vpop.permute.xlu0 %35 }
 0x5ac   :  { %vm54_vm5 = vcmp.eq.s32.totalorder %v1487_v17, %v36_v2 }
 0x5ad   :  { %v1083_v4 = vsel %vm54_vm5, 1.0, %v1407_v8 }
 0x5ae   :  { %1173 = vmatprep.mubr.msk.f32.mxu0 %vm79_vm1, %v1083_v4 }
 0x5af   :  { %v42_v9 = vpop.permute.xlu0 %41 }
 0x5b0   :  { %vm56_vm6 = vcmp.eq.s32.totalorder %v1487_v17, %v42_v9 }
 0x5b1   :  { %v1085_v14 = vsel %vm56_vm6, 1.0, %v1407_v8 }
 0x5b3   :  { %v48_v11 = vpop.permute.xlu0 %47 }
 0x5b4   :  { %vm58_vm8 = vcmp.eq.s32.totalorder %v1487_v17, %v48_v11 }
 0x5b5   :  { %v1087_v18 = vsel %vm58_vm8, 1.0, %v1407_v8 }
 0x60f   :  { %v428_v5 = vpop.permute.xlu1 %427 }
 0x610   :  { %v430_v6 = vadd.f32 %v1343_v56, %v428_v5 }
 0x612   :  { %432 = vrot.lane.b32.xlu0 %v430_v6, %s1408_s8 }
 0x620   :  { %v39_v10 = vpop.permute.xlu1 %38 }
 0x621   :  { %vm55_vm7 = vcmp.eq.s32.totalorder %v1487_v17, %v39_v10 }
 0x622   :  { %v1084_v12 = vsel %vm55_vm7, 1.0, %v1407_v8 }
 0x623   :  { %1174 = vmatmul.mubr.msk.f32.gmra.mrb[2].mxu0 %vm79_vm1, %v1084_v12 }
 0x624   :  { %v45_v15 = vpop.permute.xlu1 %44  ;;  %1176 = vmatprep.mubr.msk.f32.mxu0 %vm79_vm1, %v1085_v14 }
 0x625   :  { %vm57_vm9 = vcmp.eq.s32.totalorder %v1487_v17, %v45_v15 }
 0x626   :  { %v1086_v16 = vsel %vm57_vm9, 1.0, %v1407_v8 }
 0x627   :  { %1177 = vmatmul.mubr.msk.f32.gmra.mrb[4].mxu0 %vm79_vm1, %v1086_v16 }
 0x628   :  { %1179 = vmatprep.mubr.msk.f32.mxu0 %vm79_vm1, %v1087_v18  ;;  %v51_v19 = vpop.permute.xlu1 %50 }
 0x629   :  { %vm59_vm10 = vcmp.eq.s32.totalorder %v1487_v17, %v51_v19 }
 0x62a   :  { %v1088_v20 = vsel %vm59_vm10, 1.0, %v1407_v8 }
 0x62b   :  { %1180 = vmatmul.mubr.msk.f32.gmra.mrb[6].mxu0 %vm79_vm1, %v1088_v20 }
 0x62c   :  { %1212 = vmatprep.mubr.msk.f32.mxu0 %vm1406_vm0, %v1407_v8 }
 0x684   :  { %v433_v21 = vpop.permute.xlu0 %432 }
 0x685   :  { %1213 = vmatmul.mubr.msk.f32.vlgmr.msra.gmra.mrb[8].mxu0 %vm219_vm4, %v433_v21 }
 0x686   :  { %1300 = vmatpush3.bf16.msra.mxu0 %v1453_v7  ;;  %1234 = vmatprep.mubr.msk.f32.mxu0 %vm1406_vm0, %v1407_v8 }
 0x687   :  { %1301 = vmatprep.subr.bf16.mxu0 %v1405_v3 }
 0x68a   :  { %1303 = vmatpush3.bf16.msra.mxu0 %v1467_v13 }
 0x68b   :  { %1310 = vmatprep.subr.bf16.mxu0 %v1405_v3 }
 0x6f6   :  { %v1175_v17 = vpop.f32.mrb[2].mxu0 }
 0x6f7   :  { %v180_v23 = vpop.f32.mrb[3].mxu0 }
 0x6fa   :  { %v1565_v24 = vpop.f32.mrb[4].mxu0 }
 0x6fb   :  { %v1567_v25 = vpop.f32.mrb[5].mxu0 }
 0x6fe   :  { %v1569_v26 = vpop.f32.mrb[6].mxu0 }
 0x6ff   :  { %v1571_v27 = vpop.f32.mrb[7].mxu0 }
 0x758   :  { %v502_v28 = vpop.f32.mrb[8].mxu0 }
 0x759   :  { %v506_v29 = vadd.f32 %v502_v28, %v180_v23  ;;  %v513_v30 = vadd.f32 %v502_v28, %v1499_v22  ;;  %v1214_v31 = vpop.f32.mrb[9].mxu0 }
 0x75b   :  { %515 = vrot.lane.b32.xlu1 %v513_v30, %s1408_s8  ;;  %v1102_v32 = vmul.f32 -1.442695, %v506_v29 }
 0x75d   :  { %1344 = vpow2.f32 %v1102_v32 }
 0x767   :  { %v1345_v33 = vpop.eup %1344 }
 0x768   :  { %v510_v34 = vadd.f32 1.0, %v1345_v33 }
 0x76a   :  { %1346 = vrcp.f32 %v510_v34 }
 0x774   :  { %v1347_v35 = vpop.eup %1346 }
 0x7cd   :  { %v516_v36 = vpop.permute.xlu1 %515 }
 0x7ce   :  { %v518_v37 = vmul.f32 %v1347_v35, %v516_v36 }
 0x7d0   :  { %520 = vrot.lane.b32.xlu0 %v518_v37, %s1408_s8 }
 0x842   :  { %v521_v38 = vpop.permute.xlu0 %520 }
 0x843   :  { %v523_v39 = vadd.f32 %v521_v38, %v180_v23 }
 0x845   :  { %1348 = vtanh.f32 %v523_v39 }
 0x84f   :  { %v1349_v40 = vpop.eup %1348 }
 0x850   :  { %v525_v41 = vsub.f32 %v430_v6, %v1349_v40 }
 0x852   :  { %527 = vrot.lane.b32.xlu1 %v525_v41, %s1409_s1 }
 0x8c4   :  { %v528_v42 = vpop.permute.xlu1 %527 }
 0x8c5   :  { %v530_v43 = vmul.f32 %v1347_v35, %v528_v42 }
 0x8c7   :  { %532 = vrot.lane.b32.xlu0 %v530_v43, %s1410_s3 }
 0x939   :  { %v533_v44 = vpop.permute.xlu0 %532 }
 0x93a   :  { %v535_v45 = vadd.f32 %v1349_v40, %v533_v44 }
 0x93c   :  { %537 = vrot.lane.b32.xlu1 %v535_v45, %s1408_s8 }
 0x9ae   :  { %v538_v46 = vpop.permute.xlu1 %537 }
 0x9af   :  { %1224 = vmatmul.mubr.msk.f32.vlgmr.msra.gmra.mrb[4].mxu1 %vm219_vm4, %v538_v46 }
 0x9b0   :  { %1306 = vmatpush3.bf16.msra.mxu1 %v1453_v7  ;;  %1245 = vmatprep.mubr.msk.f32.mxu1 %vm1406_vm0, %v1407_v8 }
 0x9b1   :  { %1307 = vmatprep.subr.bf16.mxu1 %v1405_v3 }
 0x9b4   :  { %1309 = vmatpush3.bf16.msra.mxu1 %v1467_v13 }
 0x9b5   :  { %1316 = vmatprep.subr.bf16.mxu1 %v1405_v3 }
 0xa82   :  { %v607_v47 = vpop.f32.mrb[4].mxu1 }
 0xa83   :  { %v611_v48 = vadd.f32 %v1175_v17, %v607_v47  ;;  %v618_v49 = vadd.f32 %v607_v47, %v1499_v22  ;;  %v1225_v50 = vpop.f32.mrb[5].mxu1 }
 0xa85   :  { %620 = vrot.lane.b32.xlu0 %v618_v49, %s1408_s8  ;;  %v1104_v51 = vmul.f32 -1.442695, %v611_v48 }
 0xa87   :  { %1350 = vpow2.f32 %v1104_v51 }
 0xa91   :  { %v1351_v52 = vpop.eup %1350 }
 0xa92   :  { %v615_v53 = vadd.f32 1.0, %v1351_v52 }
 0xa94   :  { %1352 = vrcp.f32 %v615_v53 }
 0xa9e   :  { %v1353_v54 = vpop.eup %1352 }
 0xaf7   :  { %v621_v55 = vpop.permute.xlu0 %620 }
 0xaf8   :  { %v623_v56 = vmul.f32 %v1353_v54, %v621_v55 }
 0xafa   :  { %625 = vrot.lane.b32.xlu1 %v623_v56, %s1408_s8 }
 0xb6c   :  { %v626_v57 = vpop.permute.xlu1 %625 }
 0xb6d   :  { %v628_v58 = vadd.f32 %v1175_v17, %v626_v57 }
 0xb6f   :  { %1354 = vtanh.f32 %v628_v58 }
 0xb79   :  { %v1355_v59 = vpop.eup %1354 }
 0xb7a   :  { %v630_v60 = vsub.f32 %v535_v45, %v1355_v59 }
 0xb7c   :  { %632 = vrot.lane.b32.xlu0 %v630_v60, %s1409_s1 }
 0xbee   :  { %v633_v61 = vpop.permute.xlu0 %632 }
 0xbef   :  { %v635_v62 = vmul.f32 %v1353_v54, %v633_v61 }
 0xbf1   :  { %637 = vrot.lane.b32.xlu1 %v635_v62, %s1410_s3 }
 0xc63   :  { %v638_v63 = vpop.permute.xlu1 %637 }
 0xc64   :  { %v640_v0 = vadd.f32 %v1355_v59, %v638_v63 }
 0xc66   :  { %642 = vrot.lane.b32.xlu0 %v640_v0, %s1408_s8 }
 0xcd8   :  { %v643_v1 = vpop.permute.xlu0 %642 }
 0xcd9   :  { %1235 = vmatmul.mubr.msk.f32.vlgmr.msra.gmra.mrb[10].mxu0 %vm219_vm4, %v643_v1 }
 0xcda   :  { %1312 = vmatpush3.bf16.msra.mxu0 %v1453_v7  ;;  %1256 = vmatprep.mubr.msk.f32.mxu0 %vm1406_vm0, %v1407_v8 }
 0xcdb   :  { %1313 = vmatprep.subr.bf16.mxu0 %v1405_v3 }
 0xcde   :  { %1315 = vmatpush3.bf16.msra.mxu0 %v1467_v13 }
 0xdac   :  { %v712_v2 = vpop.f32.mrb[10].mxu0 }
 0xdad   :  { %v716_v4 = vadd.f32 %v712_v2, %v1567_v25  ;;  %v723_v5 = vadd.f32 %v712_v2, %v1499_v22  ;;  %v1236_v6 = vpop.f32.mrb[11].mxu0 }
 0xdaf   :  { %725 = vrot.lane.b32.xlu1 %v723_v5, %s1408_s8  ;;  %v1106_v9 = vmul.f32 -1.442695, %v716_v4 }
 0xdb1   :  { %1356 = vpow2.f32 %v1106_v9 }
 0xdbb   :  { %v1357_v10 = vpop.eup %1356 }
 0xdbc   :  { %v720_v11 = vadd.f32 1.0, %v1357_v10 }
 0xdbe   :  { %1358 = vrcp.f32 %v720_v11 }
 0xdc8   :  { %v1359_v12 = vpop.eup %1358 }
 0xe21   :  { %v726_v14 = vpop.permute.xlu1 %725 }
 0xe22   :  { %v728_v15 = vmul.f32 %v1359_v12, %v726_v14 }
 0xe24   :  { %730 = vrot.lane.b32.xlu0 %v728_v15, %s1408_s8 }
 0xe96   :  { %v731_v16 = vpop.permute.xlu0 %730 }
 0xe97   :  { %v733_v18 = vadd.f32 %v731_v16, %v1567_v25 }
 0xe99   :  { %1360 = vtanh.f32 %v733_v18 }
 0xea3   :  { %v1361_v19 = vpop.eup %1360 }
 0xea4   :  { %v735_v20 = vsub.f32 %v640_v0, %v1361_v19 }
 0xea6   :  { %737 = vrot.lane.b32.xlu1 %v735_v20, %s1409_s1 }
 0xf18   :  { %v738_v21 = vpop.permute.xlu1 %737 }
 0xf19   :  { %v740_v17 = vmul.f32 %v1359_v12, %v738_v21 }
 0xf1b   :  { %742 = vrot.lane.b32.xlu0 %v740_v17, %s1410_s3 }
 0xf8d   :  { %v743_v23 = vpop.permute.xlu0 %742 }
 0xf8e   :  { %v745_v28 = vadd.f32 %v1361_v19, %v743_v23 }
 0xf90   :  { %747 = vrot.lane.b32.xlu1 %v745_v28, %s1408_s8 }
0x1002   :  { %v748_v29 = vpop.permute.xlu1 %747 }
0x1003   :  { %1246 = vmatmul.mubr.msk.f32.vlgmr.msra.gmra.mrb[6].mxu1 %vm219_vm4, %v748_v29 }
0x1004   :  { %1318 = vmatpush3.bf16.msra.mxu1 %v1453_v7  ;;  %1267 = vmatprep.mubr.msk.f32.mxu1 %vm1406_vm0, %v1407_v8 }
0x1005   :  { %1319 = vmatprep.subr.bf16.mxu1 %v1405_v3 }
0x1008   :  { %1321 = vmatpush3.bf16.msra.mxu1 %v1467_v13 }
0x10d6   :  { %v817_v25 = vpop.f32.mrb[6].mxu1 }
0x10d7   :  { %v821_v30 = vadd.f32 %v1565_v24, %v817_v25  ;;  %v828_v31 = vadd.f32 %v817_v25, %v1499_v22  ;;  %v1247_v32 = vpop.f32.mrb[7].mxu1 }
0x10d9   :  { %830 = vrot.lane.b32.xlu0 %v828_v31, %s1408_s8  ;;  %v1108_v33 = vmul.f32 -1.442695, %v821_v30 }
0x10db   :  { %1362 = vpow2.f32 %v1108_v33 }
0x10e5   :  { %v1363_v34 = vpop.eup %1362 }
0x10e6   :  { %v825_v35 = vadd.f32 1.0, %v1363_v34 }
0x10e8   :  { %1364 = vrcp.f32 %v825_v35 }
0x10f2   :  { %v1365_v7 = vpop.eup %1364 }
0x114b   :  { %v831_v36 = vpop.permute.xlu0 %830 }
0x114c   :  { %v833_v8 = vmul.f32 %v1365_v7, %v831_v36 }
0x114e   :  { %835 = vrot.lane.b32.xlu1 %v833_v8, %s1408_s8 }
0x11c0   :  { %v836_v3 = vpop.permute.xlu1 %835 }
0x11c1   :  { %v838_v13 = vadd.f32 %v1565_v24, %v836_v3 }
0x11c3   :  { %1366 = vtanh.f32 %v838_v13 }
0x11cd   :  { %v1367_v37 = vpop.eup %1366 }
0x11ce   :  { %v840_v38 = vsub.f32 %v745_v28, %v1367_v37 }
0x11d0   :  { %842 = vrot.lane.b32.xlu0 %v840_v38, %s1409_s1 }
0x1242   :  { %v843_v39 = vpop.permute.xlu0 %842 }
0x1243   :  { %v845_v40 = vmul.f32 %v1365_v7, %v843_v39 }
0x1245   :  { %847 = vrot.lane.b32.xlu1 %v845_v40, %s1410_s3 }
0x12b7   :  { %v848_v41 = vpop.permute.xlu1 %847 }
0x12b8   :  { %v850_v42 = vadd.f32 %v1367_v37, %v848_v41 }
0x12ba   :  { %852 = vrot.lane.b32.xlu0 %v850_v42, %s1408_s8 }
0x132c   :  { %v853_v43 = vpop.permute.xlu0 %852 }
0x132d   :  { %1257 = vmatmul.mubr.msk.f32.vlgmr.msra.gmra.mrb[12].mxu0 %vm219_vm4, %v853_v43 }
0x1400   :  { %v922_v44 = vpop.f32.mrb[12].mxu0 }
0x1401   :  { %v926_v45 = vadd.f32 %v922_v44, %v1571_v27  ;;  %v933_v24 = vadd.f32 %v922_v44, %v1499_v22  ;;  %v1258_v46 = vpop.f32.mrb[13].mxu0 }
0x1403   :  { %935 = vrot.lane.b32.xlu1 %v933_v24, %s1408_s8  ;;  %v1110_v47 = vmul.f32 -1.442695, %v926_v45 }
0x1405   :  { %1368 = vpow2.f32 %v1110_v47 }
0x140f   :  { %v1369_v48 = vpop.eup %1368 }
0x1410   :  { %v930_v49 = vadd.f32 1.0, %v1369_v48 }
0x1412   :  { %1370 = vrcp.f32 %v930_v49 }
0x141c   :  { %v1371_v50 = vpop.eup %1370 }
0x1475   :  { %v936_v51 = vpop.permute.xlu1 %935 }
0x1476   :  { %v938_v52 = vmul.f32 %v1371_v50, %v936_v51 }
0x1478   :  { %940 = vrot.lane.b32.xlu0 %v938_v52, %s1408_s8 }
0x14ea   :  { %v941_v53 = vpop.permute.xlu0 %940 }
0x14eb   :  { %v943_v54 = vadd.f32 %v941_v53, %v1571_v27 }
0x14ed   :  { %1372 = vtanh.f32 %v943_v54 }
0x14f7   :  { %v1373_v55 = vpop.eup %1372 }
0x14f8   :  { %v945_v56 = vsub.f32 %v850_v42, %v1373_v55 }
0x14fa   :  { %947 = vrot.lane.b32.xlu1 %v945_v56, %s1409_s1 }
0x156c   :  { %v948_v57 = vpop.permute.xlu1 %947 }
0x156d   :  { %v950_v58 = vmul.f32 %v1371_v50, %v948_v57 }
0x156f   :  { %952 = vrot.lane.b32.xlu0 %v950_v58, %s1410_s3 }
0x15e1   :  { %v953_v59 = vpop.permute.xlu0 %952 }
0x15e2   :  { %v955_v60 = vadd.f32 %v1373_v55, %v953_v59 }
0x15e4   :  { %957 = vrot.lane.b32.xlu1 %v955_v60, %s1408_s8 }
0x1656   :  { %v958_v61 = vpop.permute.xlu1 %957 }
0x1657   :  { %1268 = vmatmul.mubr.msk.f32.vlgmr.msra.gmra.mrb[8].mxu1 %vm219_vm4, %v958_v61 }
0x172a   :  { %v1027_v62 = vpop.f32.mrb[8].mxu1 }
0x172b   :  { %v1031_v63 = vadd.f32 %v1569_v26, %v1027_v62  ;;  %v1038_v27 = vadd.f32 %v1027_v62, %v1499_v22  ;;  %v1269_v0 = vpop.f32.mrb[9].mxu1 }
0x172d   :  { %1040 = vrot.lane.b32.xlu0 %v1038_v27, %s1408_s8  ;;  %v1112_v1 = vmul.f32 -1.442695, %v1031_v63 }
0x172f   :  { %1374 = vpow2.f32 %v1112_v1 }
0x1739   :  { %v1375_v2 = vpop.eup %1374 }
0x173a   :  { %v1035_v4 = vadd.f32 1.0, %v1375_v2 }
0x173c   :  { %1376 = vrcp.f32 %v1035_v4 }
0x1746   :  { %v1377_v5 = vpop.eup %1376 }
0x179f   :  { %v1041_v6 = vpop.permute.xlu0 %1040 }
0x17a0   :  { %v1043_v9 = vmul.f32 %v1377_v5, %v1041_v6 }
0x17a2   :  { %1045 = vrot.lane.b32.xlu1 %v1043_v9, %s1408_s8 }
0x1814   :  { %v1046_v10 = vpop.permute.xlu1 %1045 }
0x1815   :  { %v1048_v11 = vadd.f32 %v1569_v26, %v1046_v10 }
0x1817   :  { %1378 = vtanh.f32 %v1048_v11 }
0x1821   :  { %v1379_v12 = vpop.eup %1378 }
0x1822   :  { %v1050_v14 = vsub.f32 %v955_v60, %v1379_v12 }
0x1824   :  { %1052 = vrot.lane.b32.xlu0 %v1050_v14, %s1409_s1 }
0x1896   :  { %v1053_v22 = vpop.permute.xlu0 %1052 }
0x1897   :  { %v1055_v15 = vmul.f32 %v1377_v5, %v1053_v22 }
0x1899   :  { %1057 = vrot.lane.b32.xlu1 %v1055_v15, %s1410_s3 }
0x190b   :  { %v1058_v16 = vpop.permute.xlu1 %1057 }
0x190c   :  { %v1060_v18 = vadd.f32 %v1379_v12, %v1058_v16 }
0x190e   :  { %1062 = vrot.lane.b32.xlu0 %v1060_v18, %s1408_s8 }
0x1980   :  { %v1063_v19 = vpop.permute.xlu0 %1062 }
0x1981   :  { %1066 = vst.msk [vmem:[#allocation2] sm:$0x3] %vm1065_vm11, %v1063_v19 }
0x1982   :  { %1391 = shalt.err (!%p1388_p4)
}
0x1983   :  { %s1392_s25 = scalar_lea.hbm %s1654_s4, 32 }
0x1984   :  { %p1393_p5 = scmp.ne.s32.totalorder %s1654_s4, %s1392_s25  ;;  %p1396_p6 = scmp.lt.u32.totalorder %s1392_s25, %s1654_s4 }
0x1986   :  { %p1398_p7 = pnand %p1396_p6, %p1393_p5 }
0x1988   :  { %1401 = shalt.err (!%p1398_p7)
}
0x1989   :  { %1076 = dma.vmem_to_hbm [thread:$0]  %s1074_s21, 32, %s1654_s4, [#allocation3]  }
0x198a   :  { %1402 = dma.done.wait [#allocation3], 32  }
0x198b   :  { %1403 = vsyncadd [#allocation3], 4294967264 }
0x198c   :  { %1080 = vsyncpa [#allocation3], 1 }

</bundles_post_ra>
